<compile_context>
chip_gen: v5e
topology: v5e:2x2
jax: 0.10.0
libtpu: 0.0.40
codegen_flags: <defaults>
</compile_context>

<pallas_src>
import math

import jax
import jax.numpy as jnp
from jax.experimental import pallas as pl
from jax.experimental.pallas import tpu as pltpu


def _round_up(x, m):
    return ((x + m - 1) // m) * m


def _make_gcn_kernel(has_bias):
    """Fused GCN kernel:  out[i] = sum_k adj[i,k] @ (x[k] @ W)  (+ bias)."""

    def kernel(*refs):
        if has_bias:
            adj_ref, x_ref, w_ref, bias_ref, o_ref, acc_ref = refs
        else:
            adj_ref, x_ref, w_ref, o_ref, acc_ref = refs

        k = pl.program_id(1)

        @pl.when(k == 0)
        def _():
            acc_ref[...] = jnp.zeros_like(acc_ref)

        # support tile (tk, out_f) = x_tile (tk, in_f) @ W (in_f, out_f);
        # bf16 operands, f32 accumulation on the MXU, then one bf16 rounding
        # of the intermediate before feeding the second matmul.
        support = jnp.dot(
            x_ref[...], w_ref[...], preferred_element_type=jnp.float32
        ).astype(jnp.bfloat16)

        # output tile accumulation: adj tile (tm, tk) @ support (tk, out_f).
        acc_ref[...] += jnp.dot(
            adj_ref[...], support, preferred_element_type=jnp.float32
        )

        @pl.when(k == pl.num_programs(1) - 1)
        def _():
            result = acc_ref[...]
            if has_bias:
                result = result + bias_ref[...]  # (1, out_f) broadcasts over rows
            o_ref[...] = result.astype(o_ref.dtype)

    return kernel


def _pad_to(a, shape, dtype):
    """Zero-pad 2-D array `a` to `shape` and cast to `dtype`."""
    a = a.astype(dtype)
    if a.shape == tuple(shape):
        return a
    out = jnp.zeros(shape, dtype)
    return out.at[: a.shape[0], : a.shape[1]].set(a)


def gcn_forward(x, adj, weight, bias=None):
    """output = adj @ (x @ weight) (+ bias), fused in one Pallas TPU kernel.

    x      : [N, in_features]   (float)
    adj    : [N, N]             (dense adjacency)
    weight : [in_features, out_features]
    bias   : [out_features] or None
    """
    N, in_f = x.shape
    in_f2, out_f = weight.shape
    assert in_f == in_f2, (in_f, in_f2)
    assert adj.shape == (N, N), adj.shape

    # Tile selection: big row/reduction tiles amortise per-grid-step overhead
    # and keep DMAs long; zero-padding keeps correctness for ragged N.
    if N >= 1024:
        tile_n = 512
    elif N >= 256:
        tile_n = 256
    else:
        tile_n = 128
    n_pad = _round_up(N, tile_n)
    in_f_pad = _round_up(in_f, 128)
    out_f_pad = _round_up(out_f, 128)
    # TODO(synk): tile out_f as well if out_features grows to many thousands.

    # bf16 operands for the MXU; zero padding contributes nothing to results.
    adj_p = _pad_to(adj, (n_pad, n_pad), jnp.bfloat16)
    x_p = _pad_to(x, (n_pad, in_f_pad), jnp.bfloat16)
    w_p = _pad_to(weight, (in_f_pad, out_f_pad), jnp.bfloat16)

    has_bias = bias is not None
    args = [adj_p, x_p, w_p]
    in_specs = [
        pl.BlockSpec((tile_n, tile_n), lambda i, k: (i, k)),       # adj tile
        pl.BlockSpec((tile_n, in_f_pad), lambda i, k: (k, 0)),     # x tile
        pl.BlockSpec((in_f_pad, out_f_pad), lambda i, k: (0, 0)),  # W (resident)
    ]
    if has_bias:
        bias_p = _pad_to(bias.reshape(1, out_f), (1, out_f_pad), jnp.float32)
        args.append(bias_p)
        in_specs.append(pl.BlockSpec((1, out_f_pad), lambda i, k: (0, 0)))

    grid = (n_pad // tile_n, n_pad // tile_n)  # (output rows, reduction)

    # VMEM budget: double-buffered inputs/output + f32 accumulator, with
    # headroom; cap below v7x's 64 MiB physical VMEM.
    est_bytes = (
        2 * (tile_n * tile_n * 2          # adj tile (bf16)
             + tile_n * in_f_pad * 2      # x tile (bf16)
             + in_f_pad * out_f_pad * 2   # W (bf16)
             + out_f_pad * 4              # bias (f32)
             + tile_n * out_f_pad * 4)    # out tile (f32)
        + tile_n * out_f_pad * 4          # accumulator (f32)
    )
    vmem_limit = int(min(max(2 * est_bytes, 32 * 1024 * 1024), 48 * 1024 * 1024))

    out_p = pl.pallas_call(
        _make_gcn_kernel(has_bias),
        out_shape=jax.ShapeDtypeStruct((n_pad, out_f_pad), jnp.float32),
        grid_spec=pltpu.PrefetchScalarGridSpec(
            num_scalar_prefetch=0,
            grid=grid,
            in_specs=in_specs,
            out_specs=pl.BlockSpec((tile_n, out_f_pad), lambda i, k: (i, 0)),
            scratch_shapes=[pltpu.VMEM((tile_n, out_f_pad), jnp.float32)],
        ),
        compiler_params=pltpu.CompilerParams(
            dimension_semantics=("parallel", "arbitrary"),
            vmem_limit_bytes=vmem_limit,
        ),
    )(*args)

    return out_p[:N, :out_f]


class GraphConvolution:
    """JAX/Pallas port of the PyTorch GraphConvolution module."""

    def __init__(self, in_features, out_features, bias=True, *, key=None):
        self.in_features = in_features
        self.out_features = out_features
        if key is None:
            key = jax.random.PRNGKey(0)
        k_w, k_b = jax.random.split(key)
        stdv = 1.0 / math.sqrt(out_features)
        # Deterministic analogue of reset_parameters(): U(-stdv, stdv).
        self.weight = jax.random.uniform(
            k_w, (in_features, out_features), jnp.float32, -stdv, stdv
        )
        if bias:
            self.bias = jax.random.uniform(
                k_b, (out_features,), jnp.float32, -stdv, stdv
            )
        else:
            self.bias = None

    def __call__(self, x, adj):
        return gcn_forward(x, adj, self.weight, self.bias)


if __name__ == "__main__":
    # Small shapes consistent with the module: N nodes, in/out feature dims.
    N, IN_F, OUT_F = 256, 128, 128

    key = jax.random.PRNGKey(0)
    k_x, k_adj, k_params = jax.random.split(key, 3)

    x = jax.random.normal(k_x, (N, IN_F), jnp.float32)
    # Dense "sparse" adjacency: random 0/1 pattern + self loops, row-normalized.
    adj_mask = (jax.random.uniform(k_adj, (N, N)) < 0.05).astype(jnp.float32)
    adj = adj_mask + jnp.eye(N, dtype=jnp.float32)
    adj = adj / jnp.maximum(adj.sum(axis=1, keepdims=True), 1.0)

    layer = GraphConvolution(IN_F, OUT_F, bias=True, key=k_params)

    out = layer(x, adj)
    out = jax.block_until_ready(out)

    # Reference check in plain f32 JAX (kernel uses bf16 operands + f32
    # accumulation, so allow a loose-but-tight-enough tolerance).
    ref = adj @ (x @ layer.weight) + layer.bias
    assert out.shape == (N, OUT_F)
    assert jnp.allclose(out, ref, atol=5e-2, rtol=5e-2), (
        float(jnp.max(jnp.abs(out - ref)))
    )

    # Also exercise the bias-free path (no zero-bias array / DMA).
    layer_nb = GraphConvolution(IN_F, OUT_F, bias=False, key=k_params)
    out_nb = jax.block_until_ready(layer_nb(x, adj))
    ref_nb = adj @ (x @ layer_nb.weight)
    assert jnp.allclose(out_nb, ref_nb, atol=5e-2, rtol=5e-2)

    print("KERNEL_OK")
</pallas_src>

<mosaic_0001>
module attributes {stable_mosaic.version = 11 : i64} {
  func.func @kernel(%arg0: i32, %arg1: i32, %arg2: memref<256x256xbf16, #tpu.memory_space<vmem>>, %arg3: memref<256x128xbf16, #tpu.memory_space<vmem>>, %arg4: memref<128x128xbf16, #tpu.memory_space<vmem>>, %arg5: memref<1x128xf32, #tpu.memory_space<vmem>>, %arg6: memref<256x128xf32, #tpu.memory_space<vmem>>, %arg7: memref<256x128xf32, #tpu.memory_space<vmem>>) attributes {dimension_semantics = [#tpu.dimension_semantics<parallel>, #tpu.dimension_semantics<arbitrary>], iteration_bounds = array<i64: 1, 1>, scalar_prefetch = 0 : i64, scratch_operands = 1 : i64, tpu.core_type = #tpu.core_type<tc>, window_params = [{transform_indices = @transform_0, window_bounds = array<i64: 256, 256>}, {transform_indices = @transform_1, window_bounds = array<i64: 256, 128>}, {pipeline_mode = #tpu.pipeline_mode<synchronous>, transform_indices = @transform_2, window_bounds = array<i64: 128, 128>}, {pipeline_mode = #tpu.pipeline_mode<synchronous>, transform_indices = @transform_3, window_bounds = array<i64: 1, 128>}, {transform_indices = @transform_4, window_bounds = array<i64: 256, 128>}]} {
    %c0_i32 = arith.constant 0 : i32
    %0 = arith.cmpi eq, %arg1, %c0_i32 : i32
    %1 = arith.extui %0 : i1 to i32
    %c0_i32_0 = arith.constant 0 : i32
    %2 = arith.cmpi ne, %1, %c0_i32_0 : i32
    scf.if %2 {
      %cst_13 = arith.constant 0.000000e+00 : f32
      %15 = vector.broadcast %cst_13 : f32 to vector<256x128xf32>
      %c0_14 = arith.constant 0 : index
      %c0_15 = arith.constant 0 : index
      %16 = vector.load %arg7[%c0_14, %c0_15] : memref<256x128xf32, #tpu.memory_space<vmem>>, vector<256x128xf32>
      tpu.vector_store %arg7[%c0_14, %c0_15], %15 {strides = array<i32>} : memref<256x128xf32, #tpu.memory_space<vmem>>, vector<256x128xf32>,
    } else {
    }
    %c0 = arith.constant 0 : index
    %c0_1 = arith.constant 0 : index
    %3 = vector.load %arg3[%c0, %c0_1] : memref<256x128xbf16, #tpu.memory_space<vmem>>, vector<256x128xbf16>
    %c0_2 = arith.constant 0 : index
    %c0_3 = arith.constant 0 : index
    %4 = vector.load %arg4[%c0_2, %c0_3] : memref<128x128xbf16, #tpu.memory_space<vmem>>, vector<128x128xbf16>
    %cst = arith.constant dense<0.000000e+00> : vector<256x128xf32>
    %5 = tpu.matmul %3, %4, %cst {dimension_numbers = #tpu.dot_dimension_numbers<[1], [0], [0], [1], [0, 0, 1, 1], [], []>} : vector<256x128xbf16>, vector<128x128xbf16>, vector<256x128xf32> -> vector<256x128xf32>
    %6 = arith.truncf %5 : vector<256x128xf32> to vector<256x128xbf16>
    %c0_4 = arith.constant 0 : index
    %c0_5 = arith.constant 0 : index
    %7 = vector.load %arg7[%c0_4, %c0_5] : memref<256x128xf32, #tpu.memory_space<vmem>>, vector<256x128xf32>
    %c0_6 = arith.constant 0 : index
    %c0_7 = arith.constant 0 : index
    %8 = vector.load %arg2[%c0_6, %c0_7] : memref<256x256xbf16, #tpu.memory_space<vmem>>, vector<256x256xbf16>
    %cst_8 = arith.constant dense<0.000000e+00> : vector<256x128xf32>
    %9 = tpu.matmul %8, %6, %cst_8 {dimension_numbers = #tpu.dot_dimension_numbers<[1], [0], [0], [1], [0, 0, 1, 1], [], []>} : vector<256x256xbf16>, vector<256x128xbf16>, vector<256x128xf32> -> vector<256x128xf32>
    %10 = arith.addf %7, %9 : vector<256x128xf32>
    %c0_9 = arith.constant 0 : index
    %c0_10 = arith.constant 0 : index
    %11 = vector.load %arg7[%c0_9, %c0_10] : memref<256x128xf32, #tpu.memory_space<vmem>>, vector<256x128xf32>
    tpu.vector_store %arg7[%c0_9, %c0_10], %10 {strides = array<i32>} : memref<256x128xf32, #tpu.memory_space<vmem>>, vector<256x128xf32>,
    %c0_i32_11 = arith.constant 0 : i32
    %12 = arith.cmpi eq, %arg1, %c0_i32_11 : i32
    %13 = arith.extui %12 : i1 to i32
    %c0_i32_12 = arith.constant 0 : i32
    %14 = arith.cmpi ne, %13, %c0_i32_12 : i32
    scf.if %14 {
      %c0_13 = arith.constant 0 : index
      %c0_14 = arith.constant 0 : index
      %15 = vector.load %arg7[%c0_13, %c0_14] : memref<256x128xf32, #tpu.memory_space<vmem>>, vector<256x128xf32>
      %c0_15 = arith.constant 0 : index
      %c0_16 = arith.constant 0 : index
      %16 = vector.load %arg5[%c0_15, %c0_16] : memref<1x128xf32, #tpu.memory_space<vmem>>, vector<1x128xf32>
      %17 = vector.broadcast %16 : vector<1x128xf32> to vector<256x128xf32>
      %18 = arith.addf %15, %17 : vector<256x128xf32>
      %c0_17 = arith.constant 0 : index
      %c0_18 = arith.constant 0 : index
      %19 = vector.load %arg6[%c0_17, %c0_18] : memref<256x128xf32, #tpu.memory_space<vmem>>, vector<256x128xf32>
      tpu.vector_store %arg6[%c0_17, %c0_18], %18 {strides = array<i32>} : memref<256x128xf32, #tpu.memory_space<vmem>>, vector<256x128xf32>,
    } else {
    }
    return
  }
  func.func @transform_0(%arg0: i32, %arg1: i32) -> (i32, i32) {
    %c0_i32 = arith.constant 0 : i32
    return %arg0, %arg1 : i32, i32
  }
  func.func @transform_1(%arg0: i32, %arg1: i32) -> (i32, i32) {
    %c0_i32 = arith.constant 0 : i32
    %c0_i32_0 = arith.constant 0 : i32
    return %arg1, %c0_i32 : i32, i32
  }
  func.func @transform_2(%arg0: i32, %arg1: i32) -> (i32, i32) {
    %c0_i32 = arith.constant 0 : i32
    %c0_i32_0 = arith.constant 0 : i32
    %c0_i32_1 = arith.constant 0 : i32
    return %c0_i32, %c0_i32_0 : i32, i32
  }
  func.func @transform_3(%arg0: i32, %arg1: i32) -> (i32, i32) {
    %c0_i32 = arith.constant 0 : i32
    %c0_i32_0 = arith.constant 0 : i32
    %c0_i32_1 = arith.constant 0 : i32
    return %c0_i32, %c0_i32_0 : i32, i32
  }
  func.func @transform_4(%arg0: i32, %arg1: i32) -> (i32, i32) {
    %c0_i32 = arith.constant 0 : i32
    %c0_i32_0 = arith.constant 0 : i32
    return %arg0, %c0_i32 : i32, i32
  }
}

</mosaic_0001>

<bundles_post_ra>
// kernel: tpu_custom_call.1
= control target key start
LH: loop header
LB: loop body
LE: loop exit
PB: predicated region body
PF: predicated region fallthrough
CT: control target
= control target key end

     0   :  { %9 = vsyncpa [#allocation4], 0  ;;  %s1514_s0 = inlined_call_operand.hbm [shape: bf16[256,256], index: 0, kind: input, shape index: {}]   ;;  %s1515_s1 = inlined_call_operand.hbm [shape: bf16[256,128], index: 1, kind: input, shape index: {}]   ;;  %s1516_s2 = inlined_call_operand.hbm [shape: bf16[128,128], index: 2, kind: input, shape index: {}]   ;;  %s1517_s3 = inlined_call_operand.vmem [shape: f32[1,128], index: 3, kind: input, shape index: {}]   ;;  %s1518_s4 = inlined_call_operand.hbm [shape: f32[256,128], index: 4, kind: output, shape index: {}]  }
   0x1   :  { %10 = vsyncpa [#allocation7], 0  ;;  %s29_s17 = sshll.u32 %s1515_s1, 4  ;;  %s30_s17 = int_to_ptr.hbm [resolvable:$true] %s29_s17 }
   0x2   :  { %11 = vsyncpa [#allocation5], 0  ;;  %s1402_s18 = smov [#allocation6]   ;;  %s16_s22 = sshll.u32 %s1514_s0, 4  ;;  %s17_s22 = int_to_ptr.hbm [resolvable:$true] %s16_s22 }
   0x3   :  { %s31_s19 = sshll.u32 %s1402_s18, 4  ;;  %s1403_s23 = smov 64   ;;  %s32_s19 = int_to_ptr.vmem [resolvable:$true] %s31_s19 }
   0x4   :  { %s1404_s24 = smov 4   ;;  %s1405_s25 = smov [#allocation3]  }
   0x5   :  { %37 = dma.hbm_to_vmem [thread:$0]  %s30_s17, 2048, %s32_s19, [#allocation7], %s1403_s23, %s1403_s23, %s1404_s24  }
   0x6   :  { %s18_s26 = sshll.u32 %s1405_s25, 4  ;;  %s1406_s27 = smov 128   ;;  %s19_s26 = int_to_ptr.vmem [resolvable:$true] %s18_s26 }
   0x7   :  { %s1407_s28 = smov 8   ;;  %s42_s30 = sshll.u32 %s1516_s2, 4  ;;  %s43_s30 = int_to_ptr.hbm [resolvable:$true] %s42_s30 }
   0x8   :  { %24 = dma.hbm_to_vmem [thread:$0]  %s17_s22, 4096, %s19_s26, [#allocation4], %s1406_s27, %s1406_s27, %s1407_s28  }
   0x9   :  { %s1408_s5 = smov [#allocation8]  }
   0xa   :  { %s44_s0 = sshll.u32 %s1408_s5, 4  ;;  %s45_s0 = int_to_ptr.vmem [resolvable:$true] %s44_s0 }
   0xb   :  { %50 = dma.hbm_to_vmem [thread:$0]  %s43_s30, 1024, %s45_s0, [#allocation7], %s1403_s23, %s1403_s23, %s1404_s24  }
   0xc   :  { %1396 = dma.done.wait [#allocation4], 4096  }
   0xd   :  { %1397 = vsyncadd [#allocation4], 4294963200 }
   0xe   :  { %1398 = dma.done.wait [#allocation7], 3072  }
   0xf   :  { %1399 = vsyncadd [#allocation7], 4294964224  ;;  %v1234_v0 = vld [vmem:[#allocation8 + $0x38] sm:$0xff]  ;;  %v1233_v1 = vld [vmem:[#allocation8 + $0x30] sm:$0xff]  ;;  %s973_s10 = sshll.u32 %s1518_s4, 4  ;;  %s974_s10 = int_to_ptr.hbm [resolvable:$true] %s973_s10 }
  0x10   :  { %293 = vmatpush.bf16.msra.mxu0 %v1234_v0  ;;  %1267 = vmatpush.bf16.msra.mxu3 %v1234_v0  ;;  %v1232_v2 = vld [vmem:[#allocation8 + $0x28] sm:$0xff]  ;;  %v1231_v3 = vld [vmem:[#allocation8 + $0x20] sm:$0xff]  ;;  %v1230_v4 = vld [vmem:[#allocation8 + $0x18] sm:$0xff] }
  0x11   :  { %v1229_v5 = vld [vmem:[#allocation8 + $0x10] sm:$0xff]  ;;  %v1228_v6 = vld [vmem:[#allocation8 + $0x8] sm:$0xff]  ;;  %v1227_v7 = vld [vmem:[#allocation8] sm:$0xff] }
  0x12   :  { %v1211_v8 = vld [vmem:[#allocation6] sm:$0xff]  ;;  %v1212_v10 = vld [vmem:[#allocation6 + $0x8] sm:$0xff]  ;;  %v1213_v12 = vld [vmem:[#allocation6 + $0x10] sm:$0xff] }
  0x13   :  { %v1223_v9 = vld [vmem:[#allocation6 + $0x60] sm:$0xff]  ;;  %v1224_v11 = vld [vmem:[#allocation6 + $0x68] sm:$0xff]  ;;  %v1225_v13 = vld [vmem:[#allocation6 + $0x70] sm:$0xff] }
  0x14   :  { %294 = vmatpush.bf16.msra.mxu0 %v1233_v1  ;;  %1268 = vmatpush.bf16.msra.mxu3 %v1233_v1  ;;  %v1214_v14 = vld [vmem:[#allocation6 + $0x18] sm:$0xff]  ;;  %v1215_v16 = vld [vmem:[#allocation6 + $0x20] sm:$0xff]  ;;  %v1216_v17 = vld [vmem:[#allocation6 + $0x28] sm:$0xff] }
  0x15   :  { %v1226_v15 = vld [vmem:[#allocation6 + $0x78] sm:$0xff]  ;;  %v1217_v18 = vld [vmem:[#allocation6 + $0x30] sm:$0xff]  ;;  %v1219_v20 = vld [vmem:[#allocation6 + $0x40] sm:$0xff] }
  0x16   :  { %v1218_v19 = vld [vmem:[#allocation6 + $0x38] sm:$0xff]  ;;  %v1220_v25 = vld [vmem:[#allocation6 + $0x48] sm:$0xff]  ;;  %v1221_v31 = vld [vmem:[#allocation6 + $0x50] sm:$0xff] }
  0x17   :  { %v1222_v37 = vld [vmem:[#allocation6 + $0x58] sm:$0xff]  ;;  %v1181_v0 = vld [vmem:[#allocation3 + $0xc0] sm:$0xf]  ;;  %v1260_v1 = vld [vmem:[#allocation3 + $0xc4] sm:$0xf0] }
  0x18   :  { %295 = vmatpush.bf16.msra.mxu0 %v1232_v2  ;;  %1269 = vmatpush.bf16.msra.mxu3 %v1232_v2 }
  0x1c   :  { %296 = vmatpush.bf16.msra.mxu0 %v1231_v3  ;;  %1270 = vmatpush.bf16.msra.mxu3 %v1231_v3  ;;  %v1182_v3 = vor.u32 %v1260_v1, %v1181_v0  ;;  %v1265_v1 = vld [vmem:[#allocation3 + $0xf4] sm:$0xf] }
  0x20   :  { %297 = vmatpush.bf16.msra.mxu0 %v1230_v4  ;;  %1271 = vmatpush.bf16.msra.mxu3 %v1230_v4  ;;  %v1085_v4 = vld [vmem:[#allocation3] sm:$0xf] }
  0x24   :  { %298 = vmatpush.bf16.msra.mxu0 %v1229_v5  ;;  %1272 = vmatpush.bf16.msra.mxu3 %v1229_v5  ;;  %v1236_v5 = vld [vmem:[#allocation3 + $0x4] sm:$0xf0] }
  0x28   :  { %299 = vmatpush.bf16.msra.mxu0 %v1228_v6  ;;  %1273 = vmatpush.bf16.msra.mxu3 %v1228_v6  ;;  %v1086_v6 = vor.u32 %v1236_v5, %v1085_v4  ;;  %v1141_v4 = vld [vmem:[#allocation3 + $0x70] sm:$0xf]  ;;  %v1250_v5 = vld [vmem:[#allocation3 + $0x74] sm:$0xf0] }
  0x2c   :  { %300 = vmatpush.bf16.msra.mxu0 %v1227_v7  ;;  %1274 = vmatpush.bf16.msra.mxu3 %v1227_v7 }
  0x2f   :  { %301 = vmatmul.bf16.vlgmr.msra.gmra.mxu0 %v1211_v8  ;;  %361 = vmatmul.bf16.vlgmr.msra.gmra.mxu3 %v1223_v9  ;;  %v1189_v8 = vld [vmem:[#allocation3 + $0xd0] sm:$0xf]  ;;  %v1262_v9 = vld [vmem:[#allocation3 + $0xd4] sm:$0xf0] }
  0x3f   :  { %306 = vmatmul.bf16.gmra.mxu0 %v1212_v10  ;;  %366 = vmatmul.bf16.gmra.mxu3 %v1224_v11  ;;  %v1190_v10 = vor.u32 %v1262_v9, %v1189_v8  ;;  %v1142_v8 = vor.u32 %v1250_v5, %v1141_v4 }
  0x4f   :  { %311 = vmatmul.bf16.gmra.mxu0 %v1213_v12  ;;  %371 = vmatmul.bf16.gmra.mxu3 %v1225_v13  ;;  %v1093_v12 = vld [vmem:[#allocation3 + $0x10] sm:$0xf]  ;;  %v1238_v13 = vld [vmem:[#allocation3 + $0x14] sm:$0xf0] }
  0x5f   :  { %316 = vmatmul.bf16.gmra.mxu0 %v1214_v14  ;;  %376 = vmatmul.bf16.gmra.mxu3 %v1226_v15  ;;  %v1094_v14 = vor.u32 %v1238_v13, %v1093_v12  ;;  %v1247_v12 = vld [vmem:[#allocation3 + $0x64] sm:$0xf]  ;;  %v1135_v13 = vld [vmem:[#allocation3 + $0x68] sm:$0xf0] }
  0x6f   :  { %321 = vmatmul.bf16.gmra.mxu0 %v1215_v16 }
  0x7f   :  { %326 = vmatmul.bf16.gmra.mxu0 %v1216_v17  ;;  %v1197_v17 = vld [vmem:[#allocation3 + $0xe0] sm:$0xf] }
  0x8f   :  { %331 = vmatmul.bf16.gmra.mxu0 %v1217_v18  ;;  %v1264_v18 = vld [vmem:[#allocation3 + $0xe4] sm:$0xf0] }
  0x9f   :  { %336 = vmatmul.bf16.gmra.mxu0 %v1218_v19 }
  0xac   :  { %v302_v21 = vpop.f32.mrf.mxu0 }
  0xaf   :  { %341 = vmatmul.bf16.gmra.mxu0 %v1219_v20  ;;  %v1198_v20 = vor.u32 %v1264_v18, %v1197_v17  ;;  %v1138_v17 = vor.u32 %v1247_v12, %v1135_v13  ;;  %v1257_v12 = vld [vmem:[#allocation3 + $0xb4] sm:$0xf]  ;;  %v1175_v13 = vld [vmem:[#allocation3 + $0xb8] sm:$0xf0] }
  0xb2   :  { %v362_v24 = vpop.f32.mrf.mxu3 }
  0xb4   :  { %v304_v22 = vpop.f32.mrf.mxu0 }
  0xb5   :  { %v382_v23 = vpack.c.bf16 %v304_v22, %v302_v21  ;;  %v1101_v22 = vld [vmem:[#allocation3 + $0x20] sm:$0xf] }
  0xba   :  { %v364_v27 = vpop.f32.mrf.mxu3 }
  0xbb   :  { %v394_v49 = vpack.c.bf16 %v364_v27, %v362_v24  ;;  %v1235_v24 = vld [vmem:[#allocation3 + $0x4] sm:$0xf] }
  0xbc   :  { %v307_v26 = vpop.f32.mrf.mxu0 }
  0xbf   :  { %346 = vmatmul.bf16.gmra.mxu0 %v1220_v25  ;;  %v1087_v25 = vld [vmem:[#allocation3 + $0x8] sm:$0xf0] }
  0xc2   :  { %v367_v30 = vpop.f32.mrf.mxu3 }
  0xc4   :  { %v309_v28 = vpop.f32.mrf.mxu0 }
  0xc5   :  { %v383_v29 = vpack.c.bf16 %v309_v28, %v307_v26  ;;  %v1090_v28 = vor.u32 %v1235_v24, %v1087_v25  ;;  %v1157_v24 = vld [vmem:[#allocation3 + $0x90] sm:$0xf]  ;;  %v1254_v25 = vld [vmem:[#allocation3 + $0x94] sm:$0xf0] }
  0xca   :  { %v369_v33 = vpop.f32.mrf.mxu3 }
  0xcb   :  { %v395_v48 = vpack.c.bf16 %v369_v33, %v367_v30  ;;  %v1266_v30 = vld [vmem:[#allocation3 + $0xf4] sm:$0xf0] }
  0xcc   :  { %v312_v32 = vpop.f32.mrf.mxu0  ;;  %v1242_v33 = vld [vmem:[#allocation3 + $0x34] sm:$0xf0] }
  0xcf   :  { %351 = vmatmul.bf16.gmra.mxu0 %v1221_v31 }
  0xd2   :  { %v372_v36 = vpop.f32.mrf.mxu3 }
  0xd4   :  { %v314_v34 = vpop.f32.mrf.mxu0 }
  0xd5   :  { %v384_v35 = vpack.c.bf16 %v314_v34, %v312_v32  ;;  %v1109_v32 = vld [vmem:[#allocation3 + $0x30] sm:$0xf]  ;;  %v1237_v34 = vld [vmem:[#allocation3 + $0x14] sm:$0xf] }
  0xda   :  { %v374_v39 = vpop.f32.mrf.mxu3 }
  0xdb   :  { %v396_v46 = vpack.c.bf16 %v374_v39, %v372_v36  ;;  %v1110_v36 = vor.u32 %v1242_v33, %v1109_v32  ;;  %v1183_v39 = vld [vmem:[#allocation3 + $0xc8] sm:$0xf0]  ;;  %v1165_v33 = vld [vmem:[#allocation3 + $0xa0] sm:$0xf] }
  0xdc   :  { %v317_v38 = vpop.f32.mrf.mxu0 }
  0xdf   :  { %356 = vmatmul.bf16.gmra.mxu0 %v1222_v37 }
  0xe2   :  { %v377_v42 = vpop.f32.mrf.mxu3 }
  0xe4   :  { %v319_v40 = vpop.f32.mrf.mxu0 }
  0xe5   :  { %v385_v41 = vpack.c.bf16 %v319_v40, %v317_v38  ;;  %v1259_v38 = vld [vmem:[#allocation3 + $0xc4] sm:$0xf] }
  0xe6   :  { %v1186_v40 = vor.u32 %v1259_v38, %v1183_v39  ;;  %v1460_v38 = vld [vmem:[%s1517_s3] ss:$0 sm:$0xff]  ;;  %s1409_s3 = smov [#allocation9]  }
  0xe7   :  { %s971_s7 = sshll.u32 %s1409_s3, 4  ;;  %s972_s7 = int_to_ptr.vmem [resolvable:$true] %s971_s7 }
  0xea   :  { %v379_v44 = vpop.f32.mrf.mxu3 }
  0xeb   :  { %v397_v45 = vpack.c.bf16 %v379_v44, %v377_v42  ;;  %v1244_v42 = vld [vmem:[#allocation3 + $0x44] sm:$0xf0]  ;;  %v1103_v44 = vld [vmem:[#allocation3 + $0x28] sm:$0xf0] }
  0xec   :  { %v322_v43 = vpop.f32.mrf.mxu0 }
  0xed   :  { %711 = vmatpush.bf16.msra.mxu2 %v397_v45 }
  0xf1   :  { %712 = vmatpush.bf16.msra.mxu2 %v396_v46 }
  0xf4   :  { %v324_v47 = vpop.f32.mrf.mxu0 }
  0xf5   :  { %713 = vmatpush.bf16.msra.mxu2 %v395_v48  ;;  %v386_v60 = vpack.c.bf16 %v324_v47, %v322_v43  ;;  %v1239_v43 = vld [vmem:[#allocation3 + $0x24] sm:$0xf]  ;;  %v1261_v47 = vld [vmem:[#allocation3 + $0xd4] sm:$0xf] }
  0xf9   :  { %714 = vmatpush.bf16.msra.mxu2 %v394_v49 }
  0xfc   :  { %v327_v50 = vpop.f32.mrf.mxu0 }
 0x104   :  { %v329_v51 = vpop.f32.mrf.mxu0 }
 0x105   :  { %v387_v59 = vpack.c.bf16 %v329_v51, %v327_v50  ;;  %v1125_v50 = vld [vmem:[#allocation3 + $0x50] sm:$0xf]  ;;  %v1246_v51 = vld [vmem:[#allocation3 + $0x54] sm:$0xf0] }
 0x10c   :  { %v332_v52 = vpop.f32.mrf.mxu0 }
 0x114   :  { %v334_v53 = vpop.f32.mrf.mxu0 }
 0x115   :  { %v388_v57 = vpack.c.bf16 %v334_v53, %v332_v52  ;;  %v1241_v52 = vld [vmem:[#allocation3 + $0x34] sm:$0xf]  ;;  %v1111_v53 = vld [vmem:[#allocation3 + $0x38] sm:$0xf0] }
 0x11c   :  { %v337_v54 = vpop.f32.mrf.mxu0 }
 0x124   :  { %v339_v55 = vpop.f32.mrf.mxu0 }
 0x125   :  { %v389_v56 = vpack.c.bf16 %v339_v55, %v337_v54  ;;  %v1126_v54 = vor.u32 %v1246_v51, %v1125_v50  ;;  %v1114_v55 = vor.u32 %v1241_v52, %v1111_v53 }
 0x127   :  { %622 = vmatpush.bf16.msra.mxu1 %v389_v56  ;;  %1275 = vmatpush.bf16.msrb.mxu3 %v389_v56  ;;  %v1263_v56 = vld [vmem:[#allocation3 + $0xe4] sm:$0xf] }
 0x12b   :  { %623 = vmatpush.bf16.msra.mxu1 %v388_v57  ;;  %1276 = vmatpush.bf16.msrb.mxu3 %v388_v57  ;;  %v1199_v57 = vld [vmem:[#allocation3 + $0xe8] sm:$0xf0] }
 0x12c   :  { %v342_v58 = vpop.f32.mrf.mxu0 }
 0x12f   :  { %624 = vmatpush.bf16.msra.mxu1 %v387_v59  ;;  %1277 = vmatpush.bf16.msrb.mxu3 %v387_v59  ;;  %v1133_v59 = vld [vmem:[#allocation3 + $0x60] sm:$0xf] }
 0x133   :  { %625 = vmatpush.bf16.msra.mxu1 %v386_v60  ;;  %1278 = vmatpush.bf16.msrb.mxu3 %v386_v60  ;;  %v1248_v60 = vld [vmem:[#allocation3 + $0x64] sm:$0xf0] }
 0x134   :  { %v344_v61 = vpop.f32.mrf.mxu0 }
 0x135   :  { %v390_v27 = vpack.c.bf16 %v344_v61, %v342_v58  ;;  %v1202_v58 = vor.u32 %v1263_v56, %v1199_v57  ;;  %v1243_v61 = vld [vmem:[#allocation3 + $0x44] sm:$0xf] }
 0x137   :  { %626 = vmatpush.bf16.msra.mxu1 %v385_v41  ;;  %1279 = vmatpush.bf16.msrb.mxu3 %v385_v41  ;;  %v1117_v41 = vld [vmem:[#allocation3 + $0x40] sm:$0xf] }
 0x13b   :  { %627 = vmatpush.bf16.msra.mxu1 %v384_v35  ;;  %1280 = vmatpush.bf16.msrb.mxu3 %v384_v35  ;;  %v1095_v35 = vld [vmem:[#allocation3 + $0x18] sm:$0xf0] }
 0x13c   :  { %v347_v62 = vpop.f32.mrf.mxu0  ;;  %v1098_v37 = vor.u32 %v1237_v34, %v1095_v35  ;;  %v1256_v34 = vld [vmem:[#allocation3 + $0xa4] sm:$0xf0] }
 0x13f   :  { %628 = vmatpush.bf16.msra.mxu1 %v383_v29  ;;  %1281 = vmatpush.bf16.msrb.mxu3 %v383_v29  ;;  %v1205_v29 = vld [vmem:[#allocation3 + $0xf0] sm:$0xf] }
 0x140   :  { %v1206_v31 = vor.u32 %v1266_v30, %v1205_v29  ;;  %v1251_v30 = vld [vmem:[#allocation3 + $0x84] sm:$0xf] }
 0x143   :  { %629 = vmatpush.bf16.msra.mxu1 %v382_v23  ;;  %1282 = vmatpush.bf16.msrb.mxu3 %v382_v23  ;;  %v1240_v23 = vld [vmem:[#allocation3 + $0x24] sm:$0xf0] }
 0x144   :  { %v349_v63 = vpop.f32.mrf.mxu0  ;;  %v1102_v26 = vor.u32 %v1240_v23, %v1101_v22 }
 0x145   :  { %v391_v21 = vpack.c.bf16 %v349_v63, %v347_v62  ;;  %v1119_v62 = vld [vmem:[#allocation3 + $0x48] sm:$0xf0]  ;;  %v1134_v63 = vor.u32 %v1248_v60, %v1133_v59  ;;  %v1255_v59 = vld [vmem:[#allocation3 + $0xa4] sm:$0xf] }
 0x146   :  { %690 = vmatmul.bf16.vlgmr.msrb.gmra.mxu3 %v1182_v3  ;;  %630 = vmatmul.bf16.vlgmr.msra.gmra.mxu1 %v1086_v6  ;;  %v1122_v0 = vor.u32 %v1243_v61, %v1119_v62  ;;  %v1245_v6 = vld [vmem:[#allocation3 + $0x54] sm:$0xf]  ;;  %v1167_v60 = vld [vmem:[#allocation3 + $0xa8] sm:$0xf0] }
 0x147   :  { %1283 = vmatpush.bf16.msra.mxu3 %v397_v45  ;;  %v1118_v45 = vor.u32 %v1244_v42, %v1117_v41 }
 0x14b   :  { %1284 = vmatpush.bf16.msra.mxu3 %v396_v46  ;;  %v1106_v46 = vor.u32 %v1239_v43, %v1103_v44  ;;  %v1253_v44 = vld [vmem:[#allocation3 + $0x94] sm:$0xf] }
 0x14c   :  { %v352_v2 = vpop.f32.mrf.mxu0 }
 0x14f   :  { %1285 = vmatpush.bf16.msra.mxu3 %v395_v48  ;;  %v1191_v48 = vld [vmem:[#allocation3 + $0xd8] sm:$0xf0] }
 0x153   :  { %1286 = vmatpush.bf16.msra.mxu3 %v394_v49  ;;  %v1194_v49 = vor.u32 %v1261_v47, %v1191_v48  ;;  %v1173_v47 = vld [vmem:[#allocation3 + $0xb0] sm:$0xf]  ;;  %v1258_v48 = vld [vmem:[#allocation3 + $0xb4] sm:$0xf0] }
 0x154   :  { %v354_v7 = vpop.f32.mrf.mxu0  ;;  %v1174_v52 = vor.u32 %v1258_v48, %v1173_v47 }
 0x155   :  { %v392_v19 = vpack.c.bf16 %v354_v7, %v352_v2  ;;  %v1207_v2 = vld [vmem:[#allocation3 + $0xf8] sm:$0xf0] }
 0x156   :  { %695 = vmatmul.bf16.gmra.mxu3 %v1190_v10  ;;  %635 = vmatmul.bf16.gmra.mxu1 %v1094_v14  ;;  %v1210_v3 = vor.u32 %v1265_v1, %v1207_v2  ;;  %v1127_v7 = vld [vmem:[#allocation3 + $0x58] sm:$0xf0]  ;;  %v1149_v10 = vld [vmem:[#allocation3 + $0x80] sm:$0xf] }
 0x157   :  { %v1130_v9 = vor.u32 %v1245_v6, %v1127_v7 }
 0x15c   :  { %v357_v11 = vpop.f32.mrf.mxu0 }
 0x164   :  { %v359_v15 = vpop.f32.mrf.mxu0 }
 0x165   :  { %v393_v16 = vpack.c.bf16 %v359_v15, %v357_v11  ;;  %v1252_v11 = vld [vmem:[#allocation3 + $0x84] sm:$0xf0] }
 0x166   :  { %700 = vmatmul.bf16.gmra.mxu3 %v1198_v20  ;;  %640 = vmatmul.bf16.gmra.mxu1 %v1102_v26  ;;  %v1150_v14 = vor.u32 %v1252_v11, %v1149_v10  ;;  %v1249_v20 = vld [vmem:[#allocation3 + $0x74] sm:$0xf] }
 0x167   :  { %715 = vmatpush.bf16.msra.mxu2 %v393_v16  ;;  %1287 = vmatpush.bf16.msra.mxu3 %v393_v16 }
 0x16b   :  { %716 = vmatpush.bf16.msra.mxu2 %v392_v19  ;;  %1288 = vmatpush.bf16.msra.mxu3 %v392_v19 }
 0x16f   :  { %717 = vmatpush.bf16.msra.mxu2 %v391_v21  ;;  %1289 = vmatpush.bf16.msra.mxu3 %v391_v21  ;;  %v1143_v21 = vld [vmem:[#allocation3 + $0x78] sm:$0xf0] }
 0x170   :  { %v1146_v26 = vor.u32 %v1249_v20, %v1143_v21 }
 0x173   :  { %718 = vmatpush.bf16.msra.mxu2 %v390_v27  ;;  %1290 = vmatpush.bf16.msra.mxu3 %v390_v27  ;;  %v1158_v27 = vor.u32 %v1254_v25, %v1157_v24 }
 0x176   :  { %719 = vmatmul.bf16.vlgmr.msra.gmra.mxu2 %v1090_v28  ;;  %705 = vmatmul.bf16.gmra.mxu3 %v1206_v31  ;;  %v1151_v31 = vld [vmem:[#allocation3 + $0x88] sm:$0xf0] }
 0x177   :  { %645 = vmatmul.bf16.gmra.mxu1 %v1110_v36  ;;  %v1154_v35 = vor.u32 %v1251_v30, %v1151_v31  ;;  %v1166_v36 = vor.u32 %v1256_v34, %v1165_v33 }
 0x186   :  { %724 = vmatmul.bf16.gmra.mxu2 %v1098_v37  ;;  %779 = vmatmul.bf16.vlgmr.msra.gmra.mxu3 %v1186_v40 }
 0x187   :  { %650 = vmatmul.bf16.gmra.mxu1 %v1118_v45  ;;  %v1159_v45 = vld [vmem:[#allocation3 + $0x98] sm:$0xf0] }
 0x188   :  { %v1162_v50 = vor.u32 %v1253_v44, %v1159_v45 }
 0x196   :  { %729 = vmatmul.bf16.gmra.mxu2 %v1106_v46  ;;  %784 = vmatmul.bf16.gmra.mxu3 %v1194_v49 }
 0x197   :  { %655 = vmatmul.bf16.gmra.mxu1 %v1126_v54 }
 0x1a6   :  { %734 = vmatmul.bf16.gmra.mxu2 %v1114_v55  ;;  %789 = vmatmul.bf16.gmra.mxu3 %v1202_v58 }
 0x1a7   :  { %660 = vmatmul.bf16.gmra.mxu1 %v1134_v63 }
 0x1b6   :  { %739 = vmatmul.bf16.gmra.mxu2 %v1122_v0  ;;  %794 = vmatmul.bf16.gmra.mxu3 %v1210_v3  ;;  %v1170_v0 = vor.u32 %v1255_v59, %v1167_v60 }
 0x1b7   :  { %665 = vmatmul.bf16.gmra.mxu1 %v1142_v8 }
 0x1c3   :  { %v631_v15 = vpop.f32.mrf.mxu1 }
 0x1c6   :  { %744 = vmatmul.bf16.gmra.mxu2 %v1130_v9 }
 0x1c7   :  { %670 = vmatmul.bf16.gmra.mxu1 %v1150_v14 }
 0x1c9   :  { %v1447_v16 = vpop.f32.mrf.mxu3 }
 0x1cb   :  { %v633_v18 = vpop.f32.mrf.mxu1 }
 0x1d1   :  { %v1449_v19 = vpop.f32.mrf.mxu3 }
 0x1d3   :  { %v636_v22 = vpop.f32.mrf.mxu1 }
 0x1d6   :  { %749 = vmatmul.bf16.gmra.mxu2 %v1138_v17 }
 0x1d7   :  { %675 = vmatmul.bf16.gmra.mxu1 %v1158_v27 }
 0x1d9   :  { %v1451_v23 = vpop.f32.mrf.mxu3 }
 0x1db   :  { %v638_v28 = vpop.f32.mrf.mxu1 }
 0x1e1   :  { %v1453_v29 = vpop.f32.mrf.mxu3 }
 0x1e3   :  { %v641_v37 = vpop.f32.mrf.mxu1 }
 0x1e6   :  { %754 = vmatmul.bf16.gmra.mxu2 %v1146_v26 }
 0x1e7   :  { %680 = vmatmul.bf16.gmra.mxu1 %v1166_v36 }
 0x1e9   :  { %v1455_v32 = vpop.f32.mrf.mxu3 }
 0x1eb   :  { %v643_v43 = vpop.f32.mrf.mxu1 }
 0x1f1   :  { %v1462_v41 = vpop.f32.mrf.mxu3 }
 0x1f4   :  { %v646_v54 = vpop.f32.mrf.mxu1 }
 0x1f6   :  { %759 = vmatmul.bf16.gmra.mxu2 %v1154_v35 }
 0x1f7   :  { %685 = vmatmul.bf16.gmra.mxu1 %v1174_v52 }
 0x1f9   :  { %v720_v39 = vpop.f32.mrf.mxu2  ;;  %v1465_v51 = vpop.f32.mrf.mxu3 }
 0x1fa   :  { %v721_v40 = vadd.f32 %v720_v39, %v631_v15 }
 0x1fc   :  { %v903_v42 = vadd.f32 %v1460_v38, %v721_v40  ;;  %v648_v62 = vpop.f32.mrf.mxu1 }
 0x1fe   :  { %935 = vst [vmem:[#allocation9] sm:$0xff] %v903_v42 }
 0x201   :  { %v722_v46 = vpop.f32.mrf.mxu2  ;;  %v1468_v57 = vpop.f32.mrf.mxu3 }
 0x202   :  { %v723_v49 = vadd.f32 %v722_v46, %v633_v18 }
 0x204   :  { %v904_v53 = vadd.f32 %v1460_v38, %v723_v49  ;;  %v651_v8 = vpop.f32.mrf.mxu1 }
 0x206   :  { %936 = vst [vmem:[#allocation9 + $0x8] sm:$0xff] %v904_v53  ;;  %764 = vmatmul.bf16.gmra.mxu2 %v1162_v50 }
 0x209   :  { %v725_v55 = vpop.f32.mrf.mxu2  ;;  %v780_v1 = vpop.f32.mrf.mxu3 }
 0x20a   :  { %v726_v56 = vadd.f32 %v725_v55, %v636_v22  ;;  %v781_v3 = vadd.f32 %v780_v1, %v1447_v16  ;;  %v1178_v16 = vor.u32 %v1257_v12, %v1175_v13 }
 0x20c   :  { %v905_v58 = vadd.f32 %v1460_v38, %v726_v56  ;;  %v927_v4 = vadd.f32 %v1460_v38, %v781_v3  ;;  %v653_v20 = vpop.f32.mrf.mxu1 }
 0x20e   :  { %937 = vst [vmem:[#allocation9 + $0x10] sm:$0xff] %v905_v58 }
 0x20f   :  { %959 = vst [vmem:[#allocation9 + $0xc0] sm:$0xff] %v927_v4 }
 0x211   :  { %v727_v61 = vpop.f32.mrf.mxu2  ;;  %v782_v7 = vpop.f32.mrf.mxu3 }
 0x212   :  { %v728_v63 = vadd.f32 %v727_v61, %v638_v28  ;;  %v783_v9 = vadd.f32 %v782_v7, %v1449_v19 }
 0x214   :  { %v906_v2 = vadd.f32 %v1460_v38, %v728_v63  ;;  %v928_v11 = vadd.f32 %v1460_v38, %v783_v9  ;;  %v656_v30 = vpop.f32.mrf.mxu1 }
 0x216   :  { %938 = vst [vmem:[#allocation9 + $0x18] sm:$0xff] %v906_v2  ;;  %769 = vmatmul.bf16.gmra.mxu2 %v1170_v0 }
 0x217   :  { %960 = vst [vmem:[#allocation9 + $0xc8] sm:$0xff] %v928_v11 }
 0x219   :  { %v730_v5 = vpop.f32.mrf.mxu2  ;;  %v785_v17 = vpop.f32.mrf.mxu3 }
 0x21a   :  { %v731_v6 = vadd.f32 %v730_v5, %v641_v37  ;;  %v786_v21 = vadd.f32 %v785_v17, %v1451_v23 }
 0x21c   :  { %v907_v10 = vadd.f32 %v1460_v38, %v731_v6  ;;  %v929_v19 = vadd.f32 %v1460_v38, %v786_v21  ;;  %v658_v39 = vpop.f32.mrf.mxu1 }
 0x21e   :  { %939 = vst [vmem:[#allocation9 + $0x20] sm:$0xff] %v907_v10 }
 0x21f   :  { %961 = vst [vmem:[#allocation9 + $0xd0] sm:$0xff] %v929_v19 }
 0x221   :  { %v732_v14 = vpop.f32.mrf.mxu2  ;;  %v787_v25 = vpop.f32.mrf.mxu3 }
 0x222   :  { %v733_v15 = vadd.f32 %v732_v14, %v643_v43  ;;  %v788_v26 = vadd.f32 %v787_v25, %v1453_v29 }
 0x224   :  { %v908_v18 = vadd.f32 %v1460_v38, %v733_v15  ;;  %v930_v28 = vadd.f32 %v1460_v38, %v788_v26  ;;  %v661_v48 = vpop.f32.mrf.mxu1 }
 0x226   :  { %940 = vst [vmem:[#allocation9 + $0x28] sm:$0xff] %v908_v18  ;;  %774 = vmatmul.bf16.gmra.mxu2 %v1178_v16 }
 0x227   :  { %962 = vst [vmem:[#allocation9 + $0xd8] sm:$0xff] %v930_v28 }
 0x229   :  { %v735_v22 = vpop.f32.mrf.mxu2  ;;  %v790_v34 = vpop.f32.mrf.mxu3 }
 0x22a   :  { %v736_v24 = vadd.f32 %v735_v22, %v646_v54  ;;  %v791_v35 = vadd.f32 %v790_v34, %v1455_v32 }
 0x22c   :  { %v909_v27 = vadd.f32 %v1460_v38, %v736_v24  ;;  %v931_v36 = vadd.f32 %v1460_v38, %v791_v35  ;;  %v663_v56 = vpop.f32.mrf.mxu1 }
 0x22e   :  { %941 = vst [vmem:[#allocation9 + $0x30] sm:$0xff] %v909_v27 }
 0x22f   :  { %963 = vst [vmem:[#allocation9 + $0xe0] sm:$0xff] %v931_v36 }
 0x231   :  { %v737_v31 = vpop.f32.mrf.mxu2  ;;  %v792_v40 = vpop.f32.mrf.mxu3 }
 0x232   :  { %v738_v33 = vadd.f32 %v737_v31, %v648_v62  ;;  %v793_v42 = vadd.f32 %v792_v40, %v1462_v41 }
 0x234   :  { %v910_v23 = vadd.f32 %v1460_v38, %v738_v33  ;;  %v932_v44 = vadd.f32 %v1460_v38, %v793_v42 }
 0x236   :  { %942 = vst [vmem:[#allocation9 + $0x38] sm:$0xff] %v910_v23 }
 0x237   :  { %964 = vst [vmem:[#allocation9 + $0xe8] sm:$0xff] %v932_v44 }
 0x239   :  { %v740_v37 = vpop.f32.mrf.mxu2  ;;  %v795_v47 = vpop.f32.mrf.mxu3 }
 0x23a   :  { %v741_v29 = vadd.f32 %v740_v37, %v651_v8  ;;  %v796_v49 = vadd.f32 %v795_v47, %v1465_v51  ;;  %v666_v51 = vpop.f32.mrf.mxu1 }
 0x23c   :  { %v911_v43 = vadd.f32 %v1460_v38, %v741_v29  ;;  %v933_v50 = vadd.f32 %v1460_v38, %v796_v49 }
 0x23e   :  { %943 = vst [vmem:[#allocation9 + $0x40] sm:$0xff] %v911_v43 }
 0x23f   :  { %965 = vst [vmem:[#allocation9 + $0xf0] sm:$0xff] %v933_v50 }
 0x241   :  { %v742_v45 = vpop.f32.mrf.mxu2  ;;  %v797_v41 = vpop.f32.mrf.mxu3 }
 0x242   :  { %v743_v46 = vadd.f32 %v742_v45, %v653_v20  ;;  %v798_v54 = vadd.f32 %v797_v41, %v1468_v57  ;;  %v668_v57 = vpop.f32.mrf.mxu1 }
 0x244   :  { %v912_v32 = vadd.f32 %v1460_v38, %v743_v46  ;;  %v934_v58 = vadd.f32 %v1460_v38, %v798_v54 }
 0x246   :  { %944 = vst [vmem:[#allocation9 + $0x48] sm:$0xff] %v912_v32 }
 0x247   :  { %966 = vst [vmem:[#allocation9 + $0xf8] sm:$0xff] %v934_v58 }
 0x249   :  { %v745_v52 = vpop.f32.mrf.mxu2 }
 0x24a   :  { %v746_v53 = vadd.f32 %v745_v52, %v656_v30  ;;  %v671_v6 = vpop.f32.mrf.mxu1 }
 0x24c   :  { %v913_v55 = vadd.f32 %v1460_v38, %v746_v53 }
 0x24e   :  { %945 = vst [vmem:[#allocation9 + $0x50] sm:$0xff] %v913_v55 }
 0x251   :  { %v747_v59 = vpop.f32.mrf.mxu2 }
 0x252   :  { %v748_v60 = vadd.f32 %v747_v59, %v658_v39  ;;  %v673_v11 = vpop.f32.mrf.mxu1 }
 0x254   :  { %v914_v61 = vadd.f32 %v1460_v38, %v748_v60 }
 0x256   :  { %946 = vst [vmem:[#allocation9 + $0x58] sm:$0xff] %v914_v61 }
 0x259   :  { %v750_v62 = vpop.f32.mrf.mxu2 }
 0x25a   :  { %v751_v63 = vadd.f32 %v750_v62, %v661_v48  ;;  %v676_v15 = vpop.f32.mrf.mxu1 }
 0x25c   :  { %v915_v0 = vadd.f32 %v1460_v38, %v751_v63 }
 0x25e   :  { %947 = vst [vmem:[#allocation9 + $0x60] sm:$0xff] %v915_v0 }
 0x261   :  { %v752_v1 = vpop.f32.mrf.mxu2 }
 0x262   :  { %v753_v2 = vadd.f32 %v752_v1, %v663_v56  ;;  %v678_v20 = vpop.f32.mrf.mxu1 }
 0x264   :  { %v916_v3 = vadd.f32 %v1460_v38, %v753_v2 }
 0x266   :  { %948 = vst [vmem:[#allocation9 + $0x68] sm:$0xff] %v916_v3 }
 0x269   :  { %v755_v4 = vpop.f32.mrf.mxu2 }
 0x26a   :  { %v756_v5 = vadd.f32 %v755_v4, %v666_v51  ;;  %v681_v26 = vpop.f32.mrf.mxu1 }
 0x26c   :  { %v917_v7 = vadd.f32 %v1460_v38, %v756_v5 }
 0x26e   :  { %949 = vst [vmem:[#allocation9 + $0x70] sm:$0xff] %v917_v7 }
 0x271   :  { %v757_v8 = vpop.f32.mrf.mxu2 }
 0x272   :  { %v758_v9 = vadd.f32 %v757_v8, %v668_v57  ;;  %v683_v33 = vpop.f32.mrf.mxu1 }
 0x274   :  { %v918_v10 = vadd.f32 %v1460_v38, %v758_v9 }
 0x276   :  { %950 = vst [vmem:[#allocation9 + $0x78] sm:$0xff] %v918_v10 }
 0x279   :  { %v760_v12 = vpop.f32.mrf.mxu2 }
 0x27a   :  { %v761_v13 = vadd.f32 %v760_v12, %v671_v6  ;;  %v686_v36 = vpop.f32.mrf.mxu1 }
 0x27c   :  { %v919_v14 = vadd.f32 %v1460_v38, %v761_v13 }
 0x27e   :  { %951 = vst [vmem:[#allocation9 + $0x80] sm:$0xff] %v919_v14 }
 0x281   :  { %v762_v16 = vpop.f32.mrf.mxu2 }
 0x282   :  { %v763_v17 = vadd.f32 %v762_v16, %v673_v11  ;;  %v688_v40 = vpop.f32.mrf.mxu1 }
 0x284   :  { %v920_v18 = vadd.f32 %v1460_v38, %v763_v17 }
 0x286   :  { %952 = vst [vmem:[#allocation9 + $0x88] sm:$0xff] %v920_v18 }
 0x289   :  { %v765_v21 = vpop.f32.mrf.mxu2 }
 0x28a   :  { %v766_v19 = vadd.f32 %v765_v21, %v676_v15 }
 0x28c   :  { %v921_v22 = vadd.f32 %v1460_v38, %v766_v19 }
 0x28e   :  { %953 = vst [vmem:[#allocation9 + $0x90] sm:$0xff] %v921_v22 }
 0x291   :  { %v767_v24 = vpop.f32.mrf.mxu2 }
 0x292   :  { %v768_v25 = vadd.f32 %v767_v24, %v678_v20 }
 0x294   :  { %v922_v27 = vadd.f32 %v1460_v38, %v768_v25 }
 0x296   :  { %954 = vst [vmem:[#allocation9 + $0x98] sm:$0xff] %v922_v27 }
 0x299   :  { %v770_v28 = vpop.f32.mrf.mxu2 }
 0x29a   :  { %v771_v30 = vadd.f32 %v770_v28, %v681_v26 }
 0x29c   :  { %v923_v31 = vadd.f32 %v1460_v38, %v771_v30 }
 0x29e   :  { %955 = vst [vmem:[#allocation9 + $0xa0] sm:$0xff] %v923_v31 }
 0x2a1   :  { %v772_v34 = vpop.f32.mrf.mxu2 }
 0x2a2   :  { %v773_v23 = vadd.f32 %v772_v34, %v683_v33 }
 0x2a4   :  { %v924_v35 = vadd.f32 %v1460_v38, %v773_v23 }
 0x2a6   :  { %956 = vst [vmem:[#allocation9 + $0xa8] sm:$0xff] %v924_v35 }
 0x2a9   :  { %v775_v37 = vpop.f32.mrf.mxu2 }
 0x2aa   :  { %v776_v39 = vadd.f32 %v775_v37, %v686_v36 }
 0x2ac   :  { %v925_v29 = vadd.f32 %v1460_v38, %v776_v39 }
 0x2ae   :  { %957 = vst [vmem:[#allocation9 + $0xb0] sm:$0xff] %v925_v29 }
 0x2b1   :  { %v777_v42 = vpop.f32.mrf.mxu2 }
 0x2b2   :  { %v778_v43 = vadd.f32 %v777_v42, %v688_v40 }
 0x2b4   :  { %v926_v44 = vadd.f32 %v1460_v38, %v778_v43 }
 0x2b6   :  { %958 = vst [vmem:[#allocation9 + $0xb8] sm:$0xff] %v926_v44 }
 0x2b7   :  { %979 = dma.vmem_to_hbm [thread:$0]  %s972_s7, 4096, %s974_s10, [#allocation5], %s1406_s27, %s1406_s27, %s1407_s28  }
 0x2b8   :  { %1400 = dma.done.wait [#allocation5], 4096  }
 0x2b9   :  { %1401 = vsyncadd [#allocation5], 4294963200 }
 0x2ba   :  { %984 = vsyncpa [#allocation4], 1 }
 0x2bb   :  { %985 = vsyncpa [#allocation7], 1 }
 0x2bc   :  { %986 = vsyncpa [#allocation5], 1 }

</bundles_post_ra>
